<compile_context>
chip_gen: v7x
topology: tpu7x:2x2x1
jax: 0.10.0
libtpu: 0.0.40
codegen_flags: <defaults>
</compile_context>

<pallas_src>
import functools

import jax
import jax.numpy as jnp
from jax.experimental import pallas as pl
from jax.experimental.pallas import tpu as pltpu

_LANES = 128
_VMEM_LIMIT = 48 * 1024 * 1024  # <= v7x physical VMEM, leaves double-buffer headroom


# ----------------------------------------------------------------------------
# Pallas kernels
# ----------------------------------------------------------------------------

def _conv3x3_kernel(x_ref, w_ref, b_ref, o_ref, acc_ref, *, wp, l_out):
    """3x3 conv on a flattened, guard-padded spatial axis.

    x_ref : (1, L+2G, TCI) bf16   guard-padded flat activations (G = Wp+1)
    w_ref : (9, TCI, TCO)  bf16   per-tap weight slabs
    b_ref : (1, TCO)       f32
    o_ref : (1, L, TCO)    bf16   output in padded-frame flat coordinates
    acc_ref: (L, TCO)      f32    VMEM accumulator (persists across Cin tiles)
    """
    ci = pl.program_id(2)

    @pl.when(ci == 0)
    def _():
        acc_ref[...] = jnp.zeros_like(acc_ref)

    # Accumulate the 9 taps locally, then one read-modify-write of the scratch.
    part = None
    for dy in range(3):
        for dx in range(3):
            start = dy * wp + dx                       # static shift per tap
            xs = x_ref[0, start:start + l_out, :]      # (L, TCI) bf16
            d = jnp.dot(xs, w_ref[dy * 3 + dx],
                        preferred_element_type=jnp.float32)
            part = d if part is None else part + d
    acc_ref[...] += part

    @pl.when(ci == pl.num_programs(2) - 1)
    def _():
        # epilogue kept in f32 (v5e VPU has no bf16 ALU), cast on store.
        o_ref[0] = jnp.maximum(acc_ref[...] + b_ref[...], 0.0).astype(o_ref.dtype)


def _sum_sq_diff_kernel(a_ref, b_ref, o_ref):
    # a_ref, b_ref: (rows_tile, 128); o_ref: (1,1) f32 in SMEM (accumulator).
    @pl.when(pl.program_id(0) == 0)
    def _():
        o_ref[0, 0] = 0.0
    d = a_ref[...].astype(jnp.float32) - b_ref[...].astype(jnp.float32)
    o_ref[0, 0] += jnp.sum(d * d)


def _sum_kernel(a_ref, o_ref):
    # a_ref: (rows_tile, 128); o_ref: (1,1) f32 in SMEM (accumulator).
    @pl.when(pl.program_id(0) == 0)
    def _():
        o_ref[0, 0] = 0.0
    o_ref[0, 0] += jnp.sum(a_ref[...].astype(jnp.float32))


def _tv_sums_kernel(x_ref, o_ref):
    # x_ref: (1, H, W) f32 single-channel (W on the lane axis); o_ref: (1,2) SMEM.
    @pl.when(pl.program_id(0) == 0)
    def _():
        o_ref[0, 0] = 0.0
        o_ref[0, 1] = 0.0
    x = x_ref[0]
    dh = x[1:, :] - x[:-1, :]
    dw = x[:, 1:] - x[:, :-1]
    o_ref[0, 0] += jnp.sum(dh * dh)
    o_ref[0, 1] += jnp.sum(dw * dw)


# ----------------------------------------------------------------------------
# Pallas-backed ops
# ----------------------------------------------------------------------------

def conv3x3_relu(x, w, b):
    """3x3 conv (stride 1, pad 1) + bias + ReLU.  x: (N,H,W,Cin) NHWC."""
    N, H, W, Cin = x.shape
    Cout = w.shape[-1]
    Hp, Wp = H + 2, W + 2
    L = Hp * Wp
    G = Wp + 1  # guard so every tap shift is an in-bounds static slice

    x = x.astype(jnp.bfloat16)
    xp = jnp.pad(x, ((0, 0), (1, 1), (1, 1), (0, 0)))
    xf = jnp.pad(xp.reshape(N, L, Cin), ((0, 0), (G, G), (0, 0)))  # (N, L+2G, Cin)
    w9 = w.astype(jnp.bfloat16).reshape(9, Cin, Cout)
    b2 = b.astype(jnp.float32).reshape(1, Cout)

    # Channel tiles: full channel if <=256, else 256 (128-multiple for v5e,
    # MXU-width for v6e/v7x).
    tci = Cin if Cin <= 256 else 256
    tco = Cout if Cout <= 256 else 256
    n_ci = Cin // tci
    n_co = Cout // tco

    # TODO(synk): for very large feature maps (e.g. 224x224) the spatial axis
    # should also be row-tiled (halo) and the 2x2 maxpool fused into this
    # kernel's epilogue; at these resolutions whole-image spatial blocks fit VMEM.
    kernel = functools.partial(_conv3x3_kernel, wp=Wp, l_out=L)
    out = pl.pallas_call(
        kernel,
        out_shape=jax.ShapeDtypeStruct((N, L, Cout), jnp.bfloat16),
        grid=(N, n_co, n_ci),
        in_specs=[
            pl.BlockSpec((1, L + 2 * G, tci), lambda n, co, ci: (n, 0, ci)),
            pl.BlockSpec((9, tci, tco), lambda n, co, ci: (0, ci, co)),
            pl.BlockSpec((1, tco), lambda n, co, ci: (0, co)),
        ],
        out_specs=pl.BlockSpec((1, L, tco), lambda n, co, ci: (n, 0, co)),
        scratch_shapes=[pltpu.VMEM((L, tco), jnp.float32)],
        compiler_params=pltpu.CompilerParams(
            dimension_semantics=("parallel", "parallel", "arbitrary"),
            vmem_limit_bytes=_VMEM_LIMIT),
    )(xf, w9, b2)

    # Drop the padded-frame border (glue slice).
    return out.reshape(N, Hp, Wp, Cout)[:, 1:H + 1, 1:W + 1, :]


def _flatten_tiles(x):
    """Flatten to a lane-dense (rows, 128) 2D array, zero-padded; returns
    (array, row_tile, grid)."""
    flat = x.reshape(-1)
    n = flat.shape[0]
    rows = -(-n // _LANES)
    if rows > 512:
        row_tile = 512
    else:
        row_tile = -(-rows // 8) * 8
    rows_p = -(-rows // row_tile) * row_tile
    flat = jnp.pad(flat, (0, rows_p * _LANES - n))
    return flat.reshape(rows_p, _LANES), row_tile, rows_p // row_tile


def mse_loss(a, b):
    """torch.nn.MSELoss(): mean over all elements of (a - b)**2."""
    a2, rt, g = _flatten_tiles(a)
    b2, _, _ = _flatten_tiles(b)
    s = pl.pallas_call(
        _sum_sq_diff_kernel,
        out_shape=jax.ShapeDtypeStruct((1, 1), jnp.float32),
        grid=(g,),
        in_specs=[pl.BlockSpec((rt, _LANES), lambda i: (i, 0)),
                  pl.BlockSpec((rt, _LANES), lambda i: (i, 0))],
        out_specs=pl.BlockSpec((1, 1), lambda i: (0, 0),
                               memory_space=pltpu.MemorySpace.SMEM),
        compiler_params=pltpu.CompilerParams(
            dimension_semantics=("arbitrary",),
            vmem_limit_bytes=_VMEM_LIMIT),
    )(a2, b2)
    return s[0, 0] / float(a.size)


def adversarial_loss(out_labels):
    """mean(1 - out_labels) == 1 - mean(out_labels)."""
    a2, rt, g = _flatten_tiles(out_labels.astype(jnp.float32))
    s = pl.pallas_call(
        _sum_kernel,
        out_shape=jax.ShapeDtypeStruct((1, 1), jnp.float32),
        grid=(g,),
        in_specs=[pl.BlockSpec((rt, _LANES), lambda i: (i, 0))],
        out_specs=pl.BlockSpec((1, 1), lambda i: (0, 0),
                               memory_space=pltpu.MemorySpace.SMEM),
        compiler_params=pltpu.CompilerParams(
            dimension_semantics=("arbitrary",),
            vmem_limit_bytes=_VMEM_LIMIT),
    )(a2)
    return 1.0 - s[0, 0] / float(out_labels.size)


def tv_loss(x1, tv_loss_weight=1.0):
    """TVLoss.forward.  x1: (N,H,W) single channel.

    The PyTorch module evaluates TV on the 3x channel-replicated image; that is
    numerically identical to TV on the single channel (both the sums and the
    counts scale by 3), so we run lane-dense on one channel."""
    N, H, W = x1.shape
    sums = pl.pallas_call(
        _tv_sums_kernel,
        out_shape=jax.ShapeDtypeStruct((1, 2), jnp.float32),
        grid=(N,),
        in_specs=[pl.BlockSpec((1, H, W), lambda n: (n, 0, 0))],
        out_specs=pl.BlockSpec((1, 2), lambda n: (0, 0),
                               memory_space=pltpu.MemorySpace.SMEM),
        compiler_params=pltpu.CompilerParams(
            dimension_semantics=("arbitrary",),
            vmem_limit_bytes=_VMEM_LIMIT),
    )(x1.astype(jnp.float32))
    count_h = float((H - 1) * W)   # per-channel counts (C = 1)
    count_w = float(H * (W - 1))
    return tv_loss_weight * 2.0 * (sums[0, 0] / count_h + sums[0, 1] / count_w) / float(N)


# ----------------------------------------------------------------------------
# VGG16 features[:31]: 13x (conv3x3 + ReLU), first 4 maxpools, stop before pool5
# ----------------------------------------------------------------------------

_VGG_CFG = [64, 64, 'M', 128, 128, 'M', 256, 256, 256, 'M',
            512, 512, 512, 'M', 512, 512, 512]

_VGG_MEAN = jnp.array([0.48235, 0.45882, 0.40784], jnp.float32)
_VGG_STD = jnp.float32(0.00392156862745098)


def normalize_vgg(x):
    # x: (N, H, W, 3) NHWC; (x - mean_c) / std (spec uses the same std for all channels).
    return (x - _VGG_MEAN.reshape(1, 1, 1, 3)) / _VGG_STD


def init_vgg_params(key):
    # TODO(synk): pretrained torchvision VGG16 weights are not loadable here;
    # deterministic He-initialized bf16 weights stand in for them.
    params = []
    cin = 3
    for v in _VGG_CFG:
        if v == 'M':
            continue
        key, kw = jax.random.split(key)
        w = (jax.random.normal(kw, (3, 3, cin, v), jnp.float32)
             * jnp.sqrt(2.0 / (9.0 * cin))).astype(jnp.bfloat16)
        b = jnp.zeros((v,), jnp.float32)
        params.append((w, b))
        cin = v
    return params


def _maxpool2x2(x):
    # TODO(synk): fuse the 2x2 maxpool into the preceding conv kernel's epilogue.
    N, H, W, C = x.shape
    x = x[:, :(H // 2) * 2, :(W // 2) * 2, :]
    return x.reshape(N, H // 2, 2, W // 2, 2, C).max(axis=(2, 4))


def vgg_features(x, params):
    i = 0
    for v in _VGG_CFG:
        if v == 'M':
            x = _maxpool2x2(x)
        else:
            w, b = params[i]
            x = conv3x3_relu(x, w, b)
            i += 1
    return x


# ----------------------------------------------------------------------------
# GeneratorLoss
# ----------------------------------------------------------------------------

class GeneratorLoss:
    def __init__(self, perceptual_weight, adv_weight, mse_weight, tv_weight, key):
        self.perceptual_weight = perceptual_weight
        self.adv_weight = adv_weight
        self.mse_weight = mse_weight
        self.tv_weight = tv_weight
        self.vgg_params = init_vgg_params(key)

    def __call__(self, out_labels, out_images, target_images, only_gen):
        # Inputs are NCHW (N, 1, H, W) like the PyTorch module.
        out1 = out_images[:, 0, :, :].astype(jnp.float32)     # (N, H, W)
        tgt1 = target_images[:, 0, :, :].astype(jnp.float32)
        N = out1.shape[0]

        adv = adversarial_loss(out_labels)

        # Single merged VGG pass over [out; target]: replicate 1->3 channels and
        # normalize only for the VGG input, feed the MXU bf16.
        def prep(x1):
            x3 = jnp.repeat(x1[..., None], 3, axis=-1)         # (N, H, W, 3)
            return normalize_vgg(x3)

        z = jnp.concatenate([prep(out1), prep(tgt1)], axis=0).astype(jnp.bfloat16)
        feats = vgg_features(z, self.vgg_params)                # (2N, h, w, 512) bf16
        perception = mse_loss(feats[:N], feats[N:])

        # image MSE and TV on the channel-replicated tensors are numerically
        # identical to the single-channel versions, so skip materializing out3/tgt3.
        image = mse_loss(out1, tgt1)
        tv = tv_loss(out1, tv_loss_weight=1.0)

        gen = (self.mse_weight * image
               + self.perceptual_weight * perception
               + self.tv_weight * tv)
        if only_gen:
            return gen
        return self.adv_weight * adv + gen


# ----------------------------------------------------------------------------
# Demo
# ----------------------------------------------------------------------------

if __name__ == "__main__":
    key = jax.random.PRNGKey(0)
    k1, k2, k3, k4 = jax.random.split(key, 4)

    N, H, W = 2, 16, 16
    out_images = jax.random.uniform(k1, (N, 1, H, W), jnp.float32)
    target_images = jax.random.uniform(k2, (N, 1, H, W), jnp.float32)
    out_labels = jax.random.uniform(k3, (N, 1), jnp.float32)

    loss_mod = GeneratorLoss(perceptual_weight=0.006, adv_weight=0.001,
                             mse_weight=1.0, tv_weight=2e-8, key=k4)

    loss = loss_mod(out_labels, out_images, target_images, only_gen=False)
    loss = jax.block_until_ready(loss)
    assert bool(jnp.isfinite(loss)), "loss is not finite"
    print("KERNEL_OK")
</pallas_src>

<mosaic_0001>
module attributes {stable_mosaic.version = 11 : i64} {
  func.func @_sum_kernel(%arg0: i32, %arg1: memref<8x128xf32, #tpu.memory_space<vmem>>, %arg2: memref<1x1xf32, #tpu.memory_space<smem>>) attributes {dimension_semantics = [#tpu.dimension_semantics<arbitrary>], iteration_bounds = array<i64: 1>, scalar_prefetch = 0 : i64, scratch_operands = 0 : i64, tpu.core_type = #tpu.core_type<tc>, window_params = [{transform_indices = @transform_0, window_bounds = array<i64: 8, 128>}, {transform_indices = @transform_1, window_bounds = array<i64: 1, 1>}]} {
    %c0_i32 = arith.constant 0 : i32
    %0 = arith.cmpi eq, %arg0, %c0_i32 : i32
    %1 = arith.extui %0 : i1 to i32
    %c0_i32_0 = arith.constant 0 : i32
    %2 = arith.cmpi ne, %1, %c0_i32_0 : i32
    scf.if %2 {
      %cst_6 = arith.constant 0.000000e+00 : f32
      %c0_7 = arith.constant 0 : index
      %c0_8 = arith.constant 0 : index
      %11 = memref.load %arg2[%c0_7, %c0_8] : memref<1x1xf32, #tpu.memory_space<smem>>
      memref.store %cst_6, %arg2[%c0_7, %c0_8] : memref<1x1xf32, #tpu.memory_space<smem>>
    } else {
    }
    %c0 = arith.constant 0 : index
    %c0_1 = arith.constant 0 : index
    %3 = memref.load %arg2[%c0, %c0_1] : memref<1x1xf32, #tpu.memory_space<smem>>
    %c0_2 = arith.constant 0 : index
    %c0_3 = arith.constant 0 : index
    %4 = vector.load %arg1[%c0_2, %c0_3] : memref<8x128xf32, #tpu.memory_space<vmem>>, vector<8x128xf32>
    %5 = vector.shape_cast %4 : vector<8x128xf32> to vector<1x8x128xf32>
    %cst = arith.constant dense<0.000000e+00> : vector<1xf32>
    %6 = vector.multi_reduction <add>, %5, %cst [1, 2] : vector<1x8x128xf32> to vector<1xf32>
    %7 = vector.shape_cast %6 : vector<1xf32> to vector<1x1x1xf32>
    %8 = vector.extract %7[0, 0, 0] : f32 from vector<1x1x1xf32>
    %9 = arith.addf %3, %8 : f32
    %c0_4 = arith.constant 0 : index
    %c0_5 = arith.constant 0 : index
    %10 = memref.load %arg2[%c0_4, %c0_5] : memref<1x1xf32, #tpu.memory_space<smem>>
    memref.store %9, %arg2[%c0_4, %c0_5] : memref<1x1xf32, #tpu.memory_space<smem>>
    return
  }
  func.func @transform_0(%arg0: i32) -> (i32, i32) {
    %c0_i32 = arith.constant 0 : i32
    %c0_i32_0 = arith.constant 0 : i32
    return %arg0, %c0_i32 : i32, i32
  }
  func.func @transform_1(%arg0: i32) -> (i32, i32) {
    %c0_i32 = arith.constant 0 : i32
    %c0_i32_0 = arith.constant 0 : i32
    %c0_i32_1 = arith.constant 0 : i32
    return %c0_i32, %c0_i32_0 : i32, i32
  }
}

</mosaic_0001>

<bundles_post_ra>
// kernel: tpu_custom_call.1
= control target key start
LH: loop header
LB: loop body
LE: loop exit
PB: predicated region body
PF: predicated region fallthrough
CT: control target
= control target key end

     0   :  { %6 = vsyncpa [#allocation3], 0  ;;  %s132_s0 = inlined_call_operand.hbm [shape: f32[8,128], index: 0, kind: input, shape index: {}]   ;;  %s133_s1 = inlined_call_operand.hbm [shape: f32[1,1], index: 1, kind: output, shape index: {}]  }
   0x1   :  { %7 = vsyncpa [#allocation4], 0  ;;  %s96_s6 = smov [#allocation2]   ;;  %s60_s10 = scalar_lea.hbm %s132_s0, 128 }
   0x2   :  { %s14_s7 = sshll.u32 %s96_s6, 4  ;;  %p61_p0 = scmp.ne.s32.totalorder %s132_s0, %s60_s10  ;;  %s15_s7 = int_to_ptr.vmem [resolvable:$true] %s14_s7 }
   0x3   :  { %p64_p1 = scmp.lt.u32.totalorder %s60_s10, %s132_s0 }
   0x5   :  { %p66_p2 = pnand %p64_p1, %p61_p0 }
   0x7   :  { %69 = shalt.err (!%p66_p2)
}
   0x8   :  { %s70_s15 = scalar_lea.vmem %s15_s7, 128  ;;  %p75_p4 = scmp.lt.s32.totalorder %s15_s7, %s15_s7 }
   0x9   :  { %p71_p3 = scmp.ne.s32.totalorder %s15_s7, %s70_s15  ;;  %p76_p5 = scmp.lt.s32.totalorder %s70_s15, %s70_s15 }
   0xb   :  { %p77_p6 = por %p76_p5, %p75_p4 }
   0xd   :  { %p78_p7 = pnand %p77_p6, %p71_p3 }
   0xf   :  { %81 = shalt.err (!%p78_p7)
}
  0x10   :  { %17 = dma.hbm_to_vmem [thread:$0]  %s132_s0, 128, %s15_s7, [#allocation3]  }
  0x11   :  { %92 = dma.done.wait [#allocation3], 128  }
  0x12   :  { %93 = vsyncadd [#allocation3], 4294967168  ;;  %v28_v0 = vld [vmem:[#allocation2] sm:$0xff]  ;;  %s82_s21 = scalar_lea.hbm %s133_s1, 16 }
  0x13   :  { %29 = vadd.xlane.f32.xlu0 %v28_v0  ;;  %p83_p8 = scmp.ne.s32.totalorder %s133_s1, %s82_s21  ;;  %p86_p9 = scmp.lt.u32.totalorder %s82_s21, %s133_s1 }
  0x15   :  { %p88_p10 = pnand %p86_p9, %p83_p8 }
  0xa0   :  { %v30_v1 = vpop.xlane.xlu0 %29 }
  0xa1   :  { %v31_v2 = vrot.slane %v30_v1, 4 }
  0xa3   :  { %v32_v3 = vadd.f32 %v31_v2, %v30_v1 }
  0xa5   :  { %v33_v4 = vrot.slane %v32_v3, 2 }
  0xa7   :  { %v34_v5 = vadd.f32 %v33_v4, %v32_v3 }
  0xa9   :  { %v35_v6 = vrot.slane %v34_v5, 1 }
  0xab   :  { %v36_v7 = vadd.f32 %v35_v6, %v34_v5 }
  0xad   :  { %55 = vpush %v36_v7 }
  0xde   :  { %s56_s18 = spop %55 }
  0xdf   :  { %40 = sst [smem:[#allocation5]] %s56_s18 }
  0xe0   :  { %91 = shalt.err (!%p88_p10)
}
  0xe1   :  { %s97_s25 = smov [#allocation5]  }
  0xe2   :  { %48 = dma.smem_to_hbm %s97_s25, 16, %s133_s1, [#allocation4]  }
  0xe3   :  { %94 = dma.done.wait [#allocation4], 16  }
  0xe4   :  { %95 = vsyncadd [#allocation4], 4294967280 }
  0xe5   :  { %52 = sfence }
  0xe6   :  { %53 = vsyncpa [#allocation3], 1 }
  0xe7   :  { %54 = vsyncpa [#allocation4], 1 }

</bundles_post_ra>
